<compile_context>
chip_gen: v5e
topology: v5e:2x2
jax: 0.10.0
libtpu: 0.0.40
codegen_flags: <defaults>
</compile_context>

<pallas_src>
import jax
import jax.numpy as jnp
from jax.experimental import pallas as pl
from jax.experimental.pallas import tpu as pltpu


def _pick_batch_block(B: int, L: int, target_rows: int = 512) -> int:
    """Largest divisor Bb of B such that Bb*L stays within a friendly row budget."""
    limit = max(target_rows, L)
    bb = 1
    for cand in range(1, B + 1):
        if B % cand == 0 and cand * L <= limit:
            bb = cand
    return bb


def make_attention_kernel(heads: int, dim_head: int, dim: int, seq_len: int,
                          batch_block: int):
    inner = heads * dim_head
    Dh = dim_head
    L = seq_len
    Bb = batch_block
    M = Bb * L  # rows fed to the projection matmuls

    def kernel(x_ref, wqkv_ref, wout_ref, bout_ref, o_ref):
        # x_ref:    (Bb, L, dim)            activations (f32 in HBM)
        # wqkv_ref: (dim, 3*inner)  bf16    Q columns pre-scaled by dim_head**-0.5
        # wout_ref: (inner, dim)    bf16
        # bout_ref: (1, dim)        f32
        # o_ref:    (Bb, L, dim)
        x2d = x_ref[...].reshape(M, dim).astype(jnp.bfloat16)

        # Fused QKV projection: bf16 MXU inputs, f32 accumulation.
        qkv = jnp.dot(x2d, wqkv_ref[...], preferred_element_type=jnp.float32)  # (M, 3*inner)

        # Split Q/K/V and expose the per-sample batch axis for batched attention.
        q = qkv[:, 0 * inner:1 * inner].reshape(Bb, L, inner).astype(jnp.bfloat16)
        k = qkv[:, 1 * inner:2 * inner].reshape(Bb, L, inner).astype(jnp.bfloat16)
        v = qkv[:, 2 * inner:3 * inner].reshape(Bb, L, inner).astype(jnp.bfloat16)

        w_out = wout_ref[...]  # (inner, dim), bf16 — loaded once

        # Heads are folded into the output projection: acc += o_h @ W_out[h-block].
        acc = jnp.zeros((M, dim), dtype=jnp.float32)
        for h in range(heads):
            qh = q[:, :, h * Dh:(h + 1) * Dh]  # (Bb, L, Dh), already scaled
            kh = k[:, :, h * Dh:(h + 1) * Dh]  # (Bb, L, Dh)
            vh = v[:, :, h * Dh:(h + 1) * Dh]  # (Bb, L, Dh)

            # Batched scores over the Bb samples (no explicit kh.T).
            s = jnp.einsum('bqd,bkd->bqk', qh, kh,
                           preferred_element_type=jnp.float32)  # (Bb, L, L) f32

            # Numerically stable softmax in f32; denominator via EUP approx recip.
            s_max = jnp.max(s, axis=-1, keepdims=True)
            p = jnp.exp(s - s_max)
            denom = jnp.sum(p, axis=-1, keepdims=True)
            p = p * pl.reciprocal(denom, approx=True)

            oh = jnp.einsum('bqk,bkd->bqd', p.astype(jnp.bfloat16), vh,
                            preferred_element_type=jnp.float32)  # (Bb, L, Dh) f32

            acc = acc + jnp.dot(
                oh.reshape(M, Dh).astype(jnp.bfloat16),
                w_out[h * Dh:(h + 1) * Dh, :],
                preferred_element_type=jnp.float32)

        out = acc + bout_ref[...]  # broadcast (1, dim) bias over rows
        o_ref[...] = out.reshape(Bb, L, dim).astype(o_ref.dtype)

    return kernel


def attention_pallas(x, w_qkv, w_out, b_out, *, heads: int, dim_head: int,
                     batch_block: int | None = None):
    """x: (B, L, dim); w_qkv: (dim, 3*heads*dim_head); w_out: (heads*dim_head, dim); b_out: (dim,)."""
    B, L, dim = x.shape
    inner = heads * dim_head
    assert w_qkv.shape == (dim, 3 * inner)
    assert w_out.shape == (inner, dim)
    assert b_out.shape == (dim,)

    Bb = _pick_batch_block(B, L) if batch_block is None else batch_block
    assert B % Bb == 0, "batch block must divide B"

    # Fold the softmax scale into the Q weight columns (free, wrapper-side) and
    # pre-cast weights to bf16 for the MXU.
    scale = dim_head ** (-0.5)
    w_qkv_eff = jnp.concatenate(
        [w_qkv[:, :inner] * scale, w_qkv[:, inner:]], axis=-1).astype(jnp.bfloat16)
    w_out_bf16 = w_out.astype(jnp.bfloat16)
    b_out2d = b_out.reshape(1, dim).astype(jnp.float32)

    kernel = make_attention_kernel(heads, dim_head, dim, L, Bb)

    return pl.pallas_call(
        kernel,
        out_shape=jax.ShapeDtypeStruct((B, L, dim), x.dtype),
        grid_spec=pltpu.PrefetchScalarGridSpec(
            num_scalar_prefetch=0,
            grid=(B // Bb,),
            in_specs=[
                pl.BlockSpec((Bb, L, dim), lambda b: (b, 0, 0)),
                pl.BlockSpec((dim, 3 * inner), lambda b: (0, 0)),
                pl.BlockSpec((inner, dim), lambda b: (0, 0)),
                pl.BlockSpec((1, dim), lambda b: (0, 0)),
            ],
            out_specs=pl.BlockSpec((Bb, L, dim), lambda b: (b, 0, 0)),
        ),
        compiler_params=pltpu.CompilerParams(
            dimension_semantics=("parallel",)),
    )(x, w_qkv_eff, w_out_bf16, b_out2d)


def attention_ref(x, w_qkv, w_out, b_out, *, heads: int, dim_head: int):
    """Pure-JAX f32 reference matching the PyTorch forward."""
    B, L, dim = x.shape
    inner = heads * dim_head
    qkv = x @ w_qkv
    q, k, v = jnp.split(qkv, 3, axis=-1)

    def rearr1(t):
        return t.reshape(B, L, heads, dim_head).transpose(0, 2, 1, 3)

    q, k, v = map(rearr1, (q, k, v))
    attn = jnp.einsum('bhid,bhjd->bhij', q, k) * (dim_head ** (-0.5))
    attn = jax.nn.softmax(attn, axis=-1)
    attned = jnp.einsum('bhij,bhjd->bhid', attn, v)
    attned = attned.transpose(0, 2, 1, 3).reshape(B, L, inner)
    return attned @ w_out + b_out


if __name__ == "__main__":
    # Small, module-consistent shapes.
    B, L = 2, 8
    dim = 32
    heads = 4
    dim_head = 8
    inner = heads * dim_head

    key = jax.random.PRNGKey(0)
    kx, kqkv, kwo, kbo = jax.random.split(key, 4)

    x = jax.random.normal(kx, (B, L, dim), dtype=jnp.float32)
    # Deterministic synthetic parameters (PyTorch stores (out,in); we keep (in,out)).
    w_qkv = jax.random.normal(kqkv, (dim, 3 * inner), dtype=jnp.float32) * 0.05
    w_out = jax.random.normal(kwo, (inner, dim), dtype=jnp.float32) * 0.05
    b_out = jax.random.normal(kbo, (dim,), dtype=jnp.float32) * 0.05

    out = attention_pallas(x, w_qkv, w_out, b_out, heads=heads, dim_head=dim_head)
    out = jax.block_until_ready(out)

    ref = attention_ref(x, w_qkv, w_out, b_out, heads=heads, dim_head=dim_head)
    assert out.shape == (B, L, dim)
    # bf16 matmul inputs (f32 accumulation) => relax tolerance vs the f32 reference.
    assert jnp.allclose(out, ref, atol=2e-2, rtol=2e-2), "mismatch vs reference"

    print("KERNEL_OK")
</pallas_src>

<mosaic_0001>
module attributes {stable_mosaic.version = 11 : i64} {
  func.func @kernel(%arg0: i32, %arg1: memref<2x8x32xf32, #tpu.memory_space<vmem>>, %arg2: memref<32x96xbf16, #tpu.memory_space<vmem>>, %arg3: memref<32x32xbf16, #tpu.memory_space<vmem>>, %arg4: memref<1x32xf32, #tpu.memory_space<vmem>>, %arg5: memref<2x8x32xf32, #tpu.memory_space<vmem>>) attributes {dimension_semantics = [#tpu.dimension_semantics<parallel>], iteration_bounds = array<i64: 1>, scalar_prefetch = 0 : i64, scratch_operands = 0 : i64, tpu.core_type = #tpu.core_type<tc>, window_params = [{transform_indices = @transform_0, window_bounds = array<i64: 2, 8, 32>}, {pipeline_mode = #tpu.pipeline_mode<synchronous>, transform_indices = @transform_1, window_bounds = array<i64: 32, 96>}, {pipeline_mode = #tpu.pipeline_mode<synchronous>, transform_indices = @transform_2, window_bounds = array<i64: 32, 32>}, {pipeline_mode = #tpu.pipeline_mode<synchronous>, transform_indices = @transform_3, window_bounds = array<i64: 1, 32>}, {transform_indices = @transform_4, window_bounds = array<i64: 2, 8, 32>}]} {
    %c0 = arith.constant 0 : index
    %c0_0 = arith.constant 0 : index
    %c0_1 = arith.constant 0 : index
    %0 = vector.load %arg1[%c0, %c0_0, %c0_1] : memref<2x8x32xf32, #tpu.memory_space<vmem>>, vector<2x8x32xf32>
    %1 = vector.shape_cast %0 : vector<2x8x32xf32> to vector<16x32xf32>
    %2 = arith.truncf %1 : vector<16x32xf32> to vector<16x32xbf16>
    %c0_2 = arith.constant 0 : index
    %c0_3 = arith.constant 0 : index
    %3 = vector.load %arg2[%c0_2, %c0_3] : memref<32x96xbf16, #tpu.memory_space<vmem>>, vector<32x96xbf16>
    %cst = arith.constant dense<0.000000e+00> : vector<16x96xf32>
    %4 = tpu.matmul %2, %3, %cst {dimension_numbers = #tpu.dot_dimension_numbers<[1], [0], [0], [1], [0, 0, 1, 1], [], []>} : vector<16x32xbf16>, vector<32x96xbf16>, vector<16x96xf32> -> vector<16x96xf32>
    %5 = vector.extract_strided_slice %4 {offsets = [0, 0], sizes = [16, 32], strides = [1, 1]} : vector<16x96xf32> to vector<16x32xf32>
    %6 = vector.shape_cast %5 : vector<16x32xf32> to vector<2x8x32xf32>
    %7 = arith.truncf %6 : vector<2x8x32xf32> to vector<2x8x32xbf16>
    %8 = vector.extract_strided_slice %4 {offsets = [0, 32], sizes = [16, 32], strides = [1, 1]} : vector<16x96xf32> to vector<16x32xf32>
    %9 = vector.shape_cast %8 : vector<16x32xf32> to vector<2x8x32xf32>
    %10 = arith.truncf %9 : vector<2x8x32xf32> to vector<2x8x32xbf16>
    %11 = vector.extract_strided_slice %4 {offsets = [0, 64], sizes = [16, 32], strides = [1, 1]} : vector<16x96xf32> to vector<16x32xf32>
    %12 = vector.shape_cast %11 : vector<16x32xf32> to vector<2x8x32xf32>
    %13 = arith.truncf %12 : vector<2x8x32xf32> to vector<2x8x32xbf16>
    %c0_4 = arith.constant 0 : index
    %c0_5 = arith.constant 0 : index
    %14 = vector.load %arg3[%c0_4, %c0_5] : memref<32x32xbf16, #tpu.memory_space<vmem>>, vector<32x32xbf16>
    %cst_6 = arith.constant 0.000000e+00 : f32
    %15 = vector.broadcast %cst_6 : f32 to vector<16x32xf32>
    %16 = vector.extract_strided_slice %7 {offsets = [0, 0, 0], sizes = [2, 8, 8], strides = [1, 1, 1]} : vector<2x8x32xbf16> to vector<2x8x8xbf16>
    %17 = vector.extract_strided_slice %10 {offsets = [0, 0, 0], sizes = [2, 8, 8], strides = [1, 1, 1]} : vector<2x8x32xbf16> to vector<2x8x8xbf16>
    %18 = vector.extract_strided_slice %13 {offsets = [0, 0, 0], sizes = [2, 8, 8], strides = [1, 1, 1]} : vector<2x8x32xbf16> to vector<2x8x8xbf16>
    "tpu.trace_start"() <{level = 10 : i32, message = "bqd,bkd->bqk"}> : () -> ()
    %cst_7 = arith.constant dense<0.000000e+00> : vector<2x8x8xf32>
    %19 = tpu.matmul %16, %17, %cst_7 {dimension_numbers = #tpu.dot_dimension_numbers<[2], [2], [1], [1], [0, 0, 0, 1, 1, 1], [0], [0]>} : vector<2x8x8xbf16>, vector<2x8x8xbf16>, vector<2x8x8xf32> -> vector<2x8x8xf32>
    "tpu.trace_stop"() : () -> ()
    %cst_8 = arith.constant dense<0xFF800000> : vector<2x8xf32>
    %20 = vector.multi_reduction <maximumf>, %19, %cst_8 [2] : vector<2x8x8xf32> to vector<2x8xf32>
    %21 = vector.shape_cast %20 : vector<2x8xf32> to vector<2x8x1xf32>
    %22 = vector.broadcast %21 : vector<2x8x1xf32> to vector<2x8x8xf32>
    %23 = arith.subf %19, %22 : vector<2x8x8xf32>
    %24 = math.exp %23 : vector<2x8x8xf32>
    %cst_9 = arith.constant dense<0.000000e+00> : vector<2x8xf32>
    %25 = vector.multi_reduction <add>, %24, %cst_9 [2] : vector<2x8x8xf32> to vector<2x8xf32>
    %26 = vector.shape_cast %25 : vector<2x8xf32> to vector<2x8x1xf32>
    %27 = tpu.reciprocal %26 {approx = true} : vector<2x8x1xf32> -> vector<2x8x1xf32>
    %28 = vector.broadcast %27 : vector<2x8x1xf32> to vector<2x8x8xf32>
    %29 = arith.mulf %24, %28 : vector<2x8x8xf32>
    %30 = arith.truncf %29 : vector<2x8x8xf32> to vector<2x8x8xbf16>
    "tpu.trace_start"() <{level = 10 : i32, message = "bqk,bkd->bqd"}> : () -> ()
    %cst_10 = arith.constant dense<0.000000e+00> : vector<2x8x8xf32>
    %31 = tpu.matmul %30, %18, %cst_10 {dimension_numbers = #tpu.dot_dimension_numbers<[2], [1], [1], [2], [0, 0, 0, 1, 1, 2], [0], [0]>} : vector<2x8x8xbf16>, vector<2x8x8xbf16>, vector<2x8x8xf32> -> vector<2x8x8xf32>
    "tpu.trace_stop"() : () -> ()
    %32 = vector.shape_cast %31 : vector<2x8x8xf32> to vector<16x8xf32>
    %33 = arith.truncf %32 : vector<16x8xf32> to vector<16x8xbf16>
    %34 = vector.extract_strided_slice %14 {offsets = [0, 0], sizes = [8, 32], strides = [1, 1]} : vector<32x32xbf16> to vector<8x32xbf16>
    %cst_11 = arith.constant dense<0.000000e+00> : vector<16x32xf32>
    %35 = tpu.matmul %33, %34, %cst_11 {dimension_numbers = #tpu.dot_dimension_numbers<[1], [0], [0], [1], [0, 0, 1, 1], [], []>} : vector<16x8xbf16>, vector<8x32xbf16>, vector<16x32xf32> -> vector<16x32xf32>
    %36 = arith.addf %15, %35 : vector<16x32xf32>
    %37 = vector.extract_strided_slice %7 {offsets = [0, 0, 8], sizes = [2, 8, 8], strides = [1, 1, 1]} : vector<2x8x32xbf16> to vector<2x8x8xbf16>
    %38 = vector.extract_strided_slice %10 {offsets = [0, 0, 8], sizes = [2, 8, 8], strides = [1, 1, 1]} : vector<2x8x32xbf16> to vector<2x8x8xbf16>
    %39 = vector.extract_strided_slice %13 {offsets = [0, 0, 8], sizes = [2, 8, 8], strides = [1, 1, 1]} : vector<2x8x32xbf16> to vector<2x8x8xbf16>
    "tpu.trace_start"() <{level = 10 : i32, message = "bqd,bkd->bqk"}> : () -> ()
    %cst_12 = arith.constant dense<0.000000e+00> : vector<2x8x8xf32>
    %40 = tpu.matmul %37, %38, %cst_12 {dimension_numbers = #tpu.dot_dimension_numbers<[2], [2], [1], [1], [0, 0, 0, 1, 1, 1], [0], [0]>} : vector<2x8x8xbf16>, vector<2x8x8xbf16>, vector<2x8x8xf32> -> vector<2x8x8xf32>
    "tpu.trace_stop"() : () -> ()
    %cst_13 = arith.constant dense<0xFF800000> : vector<2x8xf32>
    %41 = vector.multi_reduction <maximumf>, %40, %cst_13 [2] : vector<2x8x8xf32> to vector<2x8xf32>
    %42 = vector.shape_cast %41 : vector<2x8xf32> to vector<2x8x1xf32>
    %43 = vector.broadcast %42 : vector<2x8x1xf32> to vector<2x8x8xf32>
    %44 = arith.subf %40, %43 : vector<2x8x8xf32>
    %45 = math.exp %44 : vector<2x8x8xf32>
    %cst_14 = arith.constant dense<0.000000e+00> : vector<2x8xf32>
    %46 = vector.multi_reduction <add>, %45, %cst_14 [2] : vector<2x8x8xf32> to vector<2x8xf32>
    %47 = vector.shape_cast %46 : vector<2x8xf32> to vector<2x8x1xf32>
    %48 = tpu.reciprocal %47 {approx = true} : vector<2x8x1xf32> -> vector<2x8x1xf32>
    %49 = vector.broadcast %48 : vector<2x8x1xf32> to vector<2x8x8xf32>
    %50 = arith.mulf %45, %49 : vector<2x8x8xf32>
    %51 = arith.truncf %50 : vector<2x8x8xf32> to vector<2x8x8xbf16>
    "tpu.trace_start"() <{level = 10 : i32, message = "bqk,bkd->bqd"}> : () -> ()
    %cst_15 = arith.constant dense<0.000000e+00> : vector<2x8x8xf32>
    %52 = tpu.matmul %51, %39, %cst_15 {dimension_numbers = #tpu.dot_dimension_numbers<[2], [1], [1], [2], [0, 0, 0, 1, 1, 2], [0], [0]>} : vector<2x8x8xbf16>, vector<2x8x8xbf16>, vector<2x8x8xf32> -> vector<2x8x8xf32>
    "tpu.trace_stop"() : () -> ()
    %53 = vector.shape_cast %52 : vector<2x8x8xf32> to vector<16x8xf32>
    %54 = arith.truncf %53 : vector<16x8xf32> to vector<16x8xbf16>
    %55 = vector.extract_strided_slice %14 {offsets = [8, 0], sizes = [8, 32], strides = [1, 1]} : vector<32x32xbf16> to vector<8x32xbf16>
    %cst_16 = arith.constant dense<0.000000e+00> : vector<16x32xf32>
    %56 = tpu.matmul %54, %55, %cst_16 {dimension_numbers = #tpu.dot_dimension_numbers<[1], [0], [0], [1], [0, 0, 1, 1], [], []>} : vector<16x8xbf16>, vector<8x32xbf16>, vector<16x32xf32> -> vector<16x32xf32>
    %57 = arith.addf %36, %56 : vector<16x32xf32>
    %58 = vector.extract_strided_slice %7 {offsets = [0, 0, 16], sizes = [2, 8, 8], strides = [1, 1, 1]} : vector<2x8x32xbf16> to vector<2x8x8xbf16>
    %59 = vector.extract_strided_slice %10 {offsets = [0, 0, 16], sizes = [2, 8, 8], strides = [1, 1, 1]} : vector<2x8x32xbf16> to vector<2x8x8xbf16>
    %60 = vector.extract_strided_slice %13 {offsets = [0, 0, 16], sizes = [2, 8, 8], strides = [1, 1, 1]} : vector<2x8x32xbf16> to vector<2x8x8xbf16>
    "tpu.trace_start"() <{level = 10 : i32, message = "bqd,bkd->bqk"}> : () -> ()
    %cst_17 = arith.constant dense<0.000000e+00> : vector<2x8x8xf32>
    %61 = tpu.matmul %58, %59, %cst_17 {dimension_numbers = #tpu.dot_dimension_numbers<[2], [2], [1], [1], [0, 0, 0, 1, 1, 1], [0], [0]>} : vector<2x8x8xbf16>, vector<2x8x8xbf16>, vector<2x8x8xf32> -> vector<2x8x8xf32>
    "tpu.trace_stop"() : () -> ()
    %cst_18 = arith.constant dense<0xFF800000> : vector<2x8xf32>
    %62 = vector.multi_reduction <maximumf>, %61, %cst_18 [2] : vector<2x8x8xf32> to vector<2x8xf32>
    %63 = vector.shape_cast %62 : vector<2x8xf32> to vector<2x8x1xf32>
    %64 = vector.broadcast %63 : vector<2x8x1xf32> to vector<2x8x8xf32>
    %65 = arith.subf %61, %64 : vector<2x8x8xf32>
    %66 = math.exp %65 : vector<2x8x8xf32>
    %cst_19 = arith.constant dense<0.000000e+00> : vector<2x8xf32>
    %67 = vector.multi_reduction <add>, %66, %cst_19 [2] : vector<2x8x8xf32> to vector<2x8xf32>
    %68 = vector.shape_cast %67 : vector<2x8xf32> to vector<2x8x1xf32>
    %69 = tpu.reciprocal %68 {approx = true} : vector<2x8x1xf32> -> vector<2x8x1xf32>
    %70 = vector.broadcast %69 : vector<2x8x1xf32> to vector<2x8x8xf32>
    %71 = arith.mulf %66, %70 : vector<2x8x8xf32>
    %72 = arith.truncf %71 : vector<2x8x8xf32> to vector<2x8x8xbf16>
    "tpu.trace_start"() <{level = 10 : i32, message = "bqk,bkd->bqd"}> : () -> ()
    %cst_20 = arith.constant dense<0.000000e+00> : vector<2x8x8xf32>
    %73 = tpu.matmul %72, %60, %cst_20 {dimension_numbers = #tpu.dot_dimension_numbers<[2], [1], [1], [2], [0, 0, 0, 1, 1, 2], [0], [0]>} : vector<2x8x8xbf16>, vector<2x8x8xbf16>, vector<2x8x8xf32> -> vector<2x8x8xf32>
    "tpu.trace_stop"() : () -> ()
    %74 = vector.shape_cast %73 : vector<2x8x8xf32> to vector<16x8xf32>
    %75 = arith.truncf %74 : vector<16x8xf32> to vector<16x8xbf16>
    %76 = vector.extract_strided_slice %14 {offsets = [16, 0], sizes = [8, 32], strides = [1, 1]} : vector<32x32xbf16> to vector<8x32xbf16>
    %cst_21 = arith.constant dense<0.000000e+00> : vector<16x32xf32>
    %77 = tpu.matmul %75, %76, %cst_21 {dimension_numbers = #tpu.dot_dimension_numbers<[1], [0], [0], [1], [0, 0, 1, 1], [], []>} : vector<16x8xbf16>, vector<8x32xbf16>, vector<16x32xf32> -> vector<16x32xf32>
    %78 = arith.addf %57, %77 : vector<16x32xf32>
    %79 = vector.extract_strided_slice %7 {offsets = [0, 0, 24], sizes = [2, 8, 8], strides = [1, 1, 1]} : vector<2x8x32xbf16> to vector<2x8x8xbf16>
    %80 = vector.extract_strided_slice %10 {offsets = [0, 0, 24], sizes = [2, 8, 8], strides = [1, 1, 1]} : vector<2x8x32xbf16> to vector<2x8x8xbf16>
    %81 = vector.extract_strided_slice %13 {offsets = [0, 0, 24], sizes = [2, 8, 8], strides = [1, 1, 1]} : vector<2x8x32xbf16> to vector<2x8x8xbf16>
    "tpu.trace_start"() <{level = 10 : i32, message = "bqd,bkd->bqk"}> : () -> ()
    %cst_22 = arith.constant dense<0.000000e+00> : vector<2x8x8xf32>
    %82 = tpu.matmul %79, %80, %cst_22 {dimension_numbers = #tpu.dot_dimension_numbers<[2], [2], [1], [1], [0, 0, 0, 1, 1, 1], [0], [0]>} : vector<2x8x8xbf16>, vector<2x8x8xbf16>, vector<2x8x8xf32> -> vector<2x8x8xf32>
    "tpu.trace_stop"() : () -> ()
    %cst_23 = arith.constant dense<0xFF800000> : vector<2x8xf32>
    %83 = vector.multi_reduction <maximumf>, %82, %cst_23 [2] : vector<2x8x8xf32> to vector<2x8xf32>
    %84 = vector.shape_cast %83 : vector<2x8xf32> to vector<2x8x1xf32>
    %85 = vector.broadcast %84 : vector<2x8x1xf32> to vector<2x8x8xf32>
    %86 = arith.subf %82, %85 : vector<2x8x8xf32>
    %87 = math.exp %86 : vector<2x8x8xf32>
    %cst_24 = arith.constant dense<0.000000e+00> : vector<2x8xf32>
    %88 = vector.multi_reduction <add>, %87, %cst_24 [2] : vector<2x8x8xf32> to vector<2x8xf32>
    %89 = vector.shape_cast %88 : vector<2x8xf32> to vector<2x8x1xf32>
    %90 = tpu.reciprocal %89 {approx = true} : vector<2x8x1xf32> -> vector<2x8x1xf32>
    %91 = vector.broadcast %90 : vector<2x8x1xf32> to vector<2x8x8xf32>
    %92 = arith.mulf %87, %91 : vector<2x8x8xf32>
    %93 = arith.truncf %92 : vector<2x8x8xf32> to vector<2x8x8xbf16>
    "tpu.trace_start"() <{level = 10 : i32, message = "bqk,bkd->bqd"}> : () -> ()
    %cst_25 = arith.constant dense<0.000000e+00> : vector<2x8x8xf32>
    %94 = tpu.matmul %93, %81, %cst_25 {dimension_numbers = #tpu.dot_dimension_numbers<[2], [1], [1], [2], [0, 0, 0, 1, 1, 2], [0], [0]>} : vector<2x8x8xbf16>, vector<2x8x8xbf16>, vector<2x8x8xf32> -> vector<2x8x8xf32>
    "tpu.trace_stop"() : () -> ()
    %95 = vector.shape_cast %94 : vector<2x8x8xf32> to vector<16x8xf32>
    %96 = arith.truncf %95 : vector<16x8xf32> to vector<16x8xbf16>
    %97 = vector.extract_strided_slice %14 {offsets = [24, 0], sizes = [8, 32], strides = [1, 1]} : vector<32x32xbf16> to vector<8x32xbf16>
    %cst_26 = arith.constant dense<0.000000e+00> : vector<16x32xf32>
    %98 = tpu.matmul %96, %97, %cst_26 {dimension_numbers = #tpu.dot_dimension_numbers<[1], [0], [0], [1], [0, 0, 1, 1], [], []>} : vector<16x8xbf16>, vector<8x32xbf16>, vector<16x32xf32> -> vector<16x32xf32>
    %99 = arith.addf %78, %98 : vector<16x32xf32>
    %c0_27 = arith.constant 0 : index
    %c0_28 = arith.constant 0 : index
    %100 = vector.load %arg4[%c0_27, %c0_28] : memref<1x32xf32, #tpu.memory_space<vmem>>, vector<1x32xf32>
    %101 = vector.broadcast %100 : vector<1x32xf32> to vector<16x32xf32>
    %102 = arith.addf %99, %101 : vector<16x32xf32>
    %103 = vector.shape_cast %102 : vector<16x32xf32> to vector<2x8x32xf32>
    %c0_29 = arith.constant 0 : index
    %c0_30 = arith.constant 0 : index
    %c0_31 = arith.constant 0 : index
    %104 = vector.load %arg5[%c0_29, %c0_30, %c0_31] : memref<2x8x32xf32, #tpu.memory_space<vmem>>, vector<2x8x32xf32>
    tpu.vector_store %arg5[%c0_29, %c0_30, %c0_31], %103 {strides = array<i32>} : memref<2x8x32xf32, #tpu.memory_space<vmem>>, vector<2x8x32xf32>,
    return
  }
  func.func @transform_0(%arg0: i32) -> (i32, i32, i32) {
    %c0_i32 = arith.constant 0 : i32
    %c0_i32_0 = arith.constant 0 : i32
    %c0_i32_1 = arith.constant 0 : i32
    return %arg0, %c0_i32, %c0_i32_0 : i32, i32, i32
  }
  func.func @transform_1(%arg0: i32) -> (i32, i32) {
    %c0_i32 = arith.constant 0 : i32
    %c0_i32_0 = arith.constant 0 : i32
    %c0_i32_1 = arith.constant 0 : i32
    return %c0_i32, %c0_i32_0 : i32, i32
  }
  func.func @transform_2(%arg0: i32) -> (i32, i32) {
    %c0_i32 = arith.constant 0 : i32
    %c0_i32_0 = arith.constant 0 : i32
    %c0_i32_1 = arith.constant 0 : i32
    return %c0_i32, %c0_i32_0 : i32, i32
  }
  func.func @transform_3(%arg0: i32) -> (i32, i32) {
    %c0_i32 = arith.constant 0 : i32
    %c0_i32_0 = arith.constant 0 : i32
    %c0_i32_1 = arith.constant 0 : i32
    return %c0_i32, %c0_i32_0 : i32, i32
  }
  func.func @transform_4(%arg0: i32) -> (i32, i32, i32) {
    %c0_i32 = arith.constant 0 : i32
    %c0_i32_0 = arith.constant 0 : i32
    %c0_i32_1 = arith.constant 0 : i32
    return %arg0, %c0_i32, %c0_i32_0 : i32, i32, i32
  }
}

</mosaic_0001>

<bundles_post_ra>
// kernel: tpu_custom_call.1
= control target key start
LH: loop header
LB: loop body
LE: loop exit
PB: predicated region body
PF: predicated region fallthrough
CT: control target
= control target key end

     0   :  { %9 = vsyncpa [#allocation3], 0  ;;  %s1027_s0 = inlined_call_operand.hbm [shape: f32[2,8,32], index: 0, kind: input, shape index: {}]   ;;  %s1028_s1 = inlined_call_operand.hbm [shape: bf16[32,96], index: 1, kind: input, shape index: {}]   ;;  %s1029_s2 = inlined_call_operand.hbm [shape: bf16[32,32], index: 2, kind: input, shape index: {}]   ;;  %s1030_s3 = inlined_call_operand.vmem [shape: f32[1,32], index: 3, kind: input, shape index: {}]   ;;  %s1031_s4 = inlined_call_operand.hbm [shape: f32[2,8,32], index: 4, kind: output, shape index: {}]  }
   0x1   :  { %10 = vsyncpa [#allocation6], 0  ;;  %s29_s17 = sshll.u32 %s1028_s1, 4  ;;  %s30_s17 = int_to_ptr.hbm [resolvable:$true] %s29_s17 }
   0x2   :  { %11 = vsyncpa [#allocation4], 0  ;;  %s861_s18 = smov [#allocation5]   ;;  %s16_s22 = sshll.u32 %s1027_s0, 4  ;;  %s17_s22 = int_to_ptr.hbm [resolvable:$true] %s16_s22 }
   0x3   :  { %s31_s19 = sshll.u32 %s861_s18, 4  ;;  %s862_s23 = smov 64   ;;  %s32_s19 = int_to_ptr.vmem [resolvable:$true] %s31_s19 }
   0x4   :  { %s863_s24 = smov 4   ;;  %s864_s25 = smov [#allocation2]  }
   0x5   :  { %37 = dma.hbm_to_vmem [thread:$0]  %s30_s17, 256, %s32_s19, [#allocation6], %s862_s23, %s862_s23, %s863_s24  }
   0x6   :  { %s18_s26 = sshll.u32 %s864_s25, 4  ;;  %s865_s27 = smov 128   ;;  %s19_s26 = int_to_ptr.vmem [resolvable:$true] %s18_s26 }
   0x7   :  { %s866_s1 = smov 8   ;;  %s42_s30 = sshll.u32 %s1029_s2, 4  ;;  %s43_s30 = int_to_ptr.hbm [resolvable:$true] %s42_s30 }
   0x8   :  { %24 = dma.hbm_to_vmem [thread:$0]  %s17_s22, 256, %s19_s26, [#allocation3], %s865_s27, %s865_s27, %s866_s1  }
   0x9   :  { %s867_s0 = smov [#allocation7]  }
   0xa   :  { %s44_s5 = sshll.u32 %s867_s0, 4  ;;  %s45_s5 = int_to_ptr.vmem [resolvable:$true] %s44_s5 }
   0xb   :  { %50 = dma.hbm_to_vmem [thread:$0]  %s43_s30, 256, %s45_s5, [#allocation6], %s862_s23, %s862_s23, %s863_s24  }
   0xc   :  { %855 = dma.done.wait [#allocation3], 256  }
   0xd   :  { %856 = vsyncadd [#allocation3], 4294967040 }
   0xe   :  { %857 = dma.done.wait [#allocation6], 512  }
   0xf   :  { %858 = vsyncadd [#allocation6], 4294966784  ;;  %v707_v0 = vld [vmem:[#allocation5 + $0x8] sm:$0xff]  ;;  %v706_v1 = vld [vmem:[#allocation5] sm:$0xff]  ;;  %vm85_vm0 = vcmask 261120   ;;  %s868_s2 = smov 96  }
  0x10   :  { %95 = vmatpush.bf16.msra.mxu0 %v707_v0  ;;  %v66_v2 = vld [vmem:[#allocation2] sm:$0xff]  ;;  %v67_v3 = vld [vmem:[#allocation2 + $0x8] sm:$0xff]  ;;  %s869_s6 = smov 88   ;;  %s870_s7 = smov 120   ;;  %vm114_vm1 = vcmask 64512   ;;  %vm187_vm2 = vcmask 1043456  }
  0x11   :  { %v68_v4 = vpack.c.bf16 %v67_v3, %v66_v2  ;;  %s871_s8 = smov 56   ;;  %s872_s9 = smov 80   ;;  %v106_v63 = vld [vmem:[#allocation7 + $0x4] sm:$0xf] }
  0x12   :  { %s873_s10 = smov 112   ;;  %s874_s11 = smov 48   ;;  %v343_v0 = vsel %vm187_vm2, %v106_v63, 0 }
  0x13   :  { %s875_s12 = smov 72   ;;  %s876_s13 = smov 104  }
  0x14   :  { %96 = vmatpush.bf16.msra.mxu0 %v706_v1  ;;  %s877_s14 = smov 40   ;;  %s878_s17 = smov [#allocation8]  }
  0x15   :  { %s661_s18 = sshll.u32 %s878_s17, 4  ;;  %s663_s21 = sshll.u32 %s1031_s4, 4  ;;  %s662_s18 = int_to_ptr.vmem [resolvable:$true] %s661_s18  ;;  %s664_s21 = int_to_ptr.hbm [resolvable:$true] %s663_s21 }
  0x17   :  { %685 = vmatmul.msk.bf16.vlgmr.msra.gmra.mxu0 %vm85_vm0, %v68_v4 }
  0x94   :  { %v98_v5 = vpop.f32.mrf.mxu0 }
  0x95   :  { %v103_v6 = vpack.c.bf16 %v98_v5, %v98_v5 }
  0x97   :  { %v110_v7 = vunpack.c.l.b16 %v103_v6 }
  0x99   :  { %v921_v8 = vpack.c.b16 %v110_v7, %v110_v7 }
  0x9b   :  { %112 = vrot.lane.b32.xlu1 %v921_v8, %s868_s2  ;;  %228 = vrot.lane.b32.xlu0 %v921_v8, %s869_s6 }
  0x9c   :  { %v100_v9 = vpop.f32.mrf.mxu0 }
  0x9d   :  { %v104_v10 = vpack.c.bf16 %v100_v9, %v100_v9 }
  0x9f   :  { %v135_v11 = vunpack.c.l.b16 %v104_v10 }
  0xa1   :  { %v925_v12 = vpack.c.b16 %v135_v11, %v135_v11 }
  0xa3   :  { %226 = vrot.lane.b32.xlu0 %v921_v8, %s870_s7  ;;  %251 = vrot.lane.b32.xlu2 %v925_v12, %s869_s6 }
  0xa4   :  { %137 = vrot.lane.b32.xlu1 %v925_v12, %s868_s2 }
  0xab   :  { %249 = vrot.lane.b32.xlu2 %v925_v12, %s870_s7 }
  0xb3   :  { %296 = vrot.lane.b32.xlu2 %v921_v8, %s871_s8 }
  0xfd   :  { %v252_v13 = vpop.permute.xlu2 %251 }
  0xfe   :  { %v257_v19 = vsel %vm114_vm1, %v252_v13, 0 }
 0x105   :  { %v250_v14 = vpop.permute.xlu2 %249 }
 0x10d   :  { %v113_v15 = vpop.permute.xlu1 %112  ;;  %v229_v16 = vpop.permute.xlu0 %228 }
 0x10e   :  { %v119_v17 = vsel %vm114_vm1, %v113_v15, 0  ;;  %v234_v18 = vsel %vm114_vm1, %v229_v16, 0  ;;  %v297_v20 = vpop.permute.xlu2 %296 }
 0x10f   :  { %128 = vmatpush.bf16.xpose.msra.mxu1 %v119_v17  ;;  %243 = vmatpush.bf16.xpose.msrb.mxu0 %v234_v18  ;;  %v302_v24 = vsel %vm187_vm2, %v297_v20, 0 }
 0x115   :  { %v227_v21 = vpop.permute.xlu0 %226 }
 0x116   :  { %v138_v22 = vpop.permute.xlu1 %137  ;;  %686 = vmatmul.msk.bf16.vlgmr.msra.gmra.mxu1 %vm114_vm1, %v103_v6  ;;  %690 = vmatmul.msk.bf16.vlgmr.msrb.gmra.mxu0 %vm114_vm1, %v227_v21 }
 0x117   :  { %266 = vmatpush.bf16.xpose.msrb.mxu1 %v257_v19  ;;  %v143_v23 = vsel %vm114_vm1, %v138_v22, 0  ;;  %352 = vmatpush.bf16.msra.mxu0 %v343_v0 }
 0x118   :  { %152 = vmatpush.bf16.xpose.msra.mxu2 %v143_v23 }
 0x11f   :  { %687 = vmatmul.msk.bf16.vlgmr.msra.gmra.mxu2 %vm114_vm1, %v104_v10 }
 0x120   :  { %311 = vmatpush.bf16.msrb.mxu2 %v302_v24 }
 0x126   :  { %691 = vmatmul.msk.bf16.vlgmr.msrb.gmra.mxu1 %vm114_vm1, %v250_v14 }
 0x193   :  { %v130_v25 = vpop.f32.mrf.mxu1  ;;  %v245_v26 = vpop.f32.mrf.mxu0 }
 0x194   :  { %v272_v27 = vsel %vm114_vm1, %v245_v26, -inf  ;;  %v158_v28 = vsel %vm114_vm1, %v130_v25, -inf }
 0x195   :  { %273 = vmax.xlane.f32.xlu0 %v272_v27  ;;  %159 = vmax.xlane.f32.xlu2 %v158_v28 }
 0x19b   :  { %v132_v29 = vpop.f32.mrf.mxu1  ;;  %v247_v30 = vpop.f32.mrf.mxu0 }
 0x1a2   :  { %v154_v31 = vpop.f32.mrf.mxu2 }
 0x1a3   :  { %v268_v32 = vpop.f32.mrf.mxu1  ;;  %v161_v33 = vsel %vm114_vm1, %v154_v31, -inf }
 0x1a4   :  { %162 = vmax.xlane.f32.xlu2 %v161_v33  ;;  %v275_v36 = vsel %vm114_vm1, %v268_v32, -inf }
 0x1a9   :  { %381 = vrot.lane.b32.xlu0 %v921_v8, %s872_s9 }
 0x1aa   :  { %v156_v34 = vpop.f32.mrf.mxu2 }
 0x1ab   :  { %v270_v35 = vpop.f32.mrf.mxu1 }
 0x1ac   :  { %276 = vmax.xlane.f32.xlu2 %v275_v36  ;;  %v105_v36 = vld [vmem:[#allocation7] sm:$0xf] }
 0x1c4   :  { %182 = vrot.lane.b32.xlu2 %v921_v8, %s862_s23 }
 0x1cc   :  { %204 = vrot.lane.b32.xlu2 %v925_v12, %s862_s23 }
 0x208   :  { %v274_v37 = vpop.xlane.xlu0 %273  ;;  %v160_v38 = vpop.xlane.xlu2 %159 }
 0x209   :  { %v278_v39 = vsub.f32 %v245_v26, %v274_v37  ;;  %v164_v40 = vsub.f32 %v130_v25, %v160_v38  ;;  %v363_v37 = vsel %vm187_vm2, %v105_v36, 0 }
 0x20a   :  { %372 = vmatpush.bf16.msra.mxu1 %v363_v37 }
 0x20b   :  { %v280_v41 = vmul.f32 1.442695, %v278_v39  ;;  %v166_v42 = vmul.f32 1.442695, %v164_v40 }
 0x20d   :  { %727 = vpow2.f32 %v280_v41 }
 0x20e   :  { %729 = vpow2.f32 %v166_v42 }
 0x213   :  { %v728_v43 = vpop.eup %727 }
 0x214   :  { %v730_v44 = vpop.eup %729  ;;  %v284_v45 = vsel %vm114_vm1, %v728_v43, 0.0 }
 0x215   :  { %v170_v46 = vsel %vm114_vm1, %v730_v44, 0.0  ;;  %285 = vadd.xlane.f32.xlu1 %v284_v45 }
 0x216   :  { %171 = vadd.xlane.f32.xlu0 %v170_v46 }
 0x217   :  { %v163_v47 = vpop.xlane.xlu2 %162 }
 0x218   :  { %v165_v59 = vsub.f32 %v154_v31, %v163_v47 }
 0x21a   :  { %v168_v60 = vmul.f32 1.442695, %v165_v59 }
 0x21b   :  { %v382_v48 = vpop.permute.xlu0 %381 }
 0x21c   :  { %v387_v49 = vsel %vm114_vm1, %v382_v48, 0 }
 0x21d   :  { %396 = vmatpush.bf16.xpose.msra.mxu2 %v387_v49 }
 0x21f   :  { %v277_v50 = vpop.xlane.xlu2 %276 }
 0x220   :  { %v279_v51 = vsub.f32 %v268_v32, %v277_v50 }
 0x222   :  { %v282_v52 = vmul.f32 1.442695, %v279_v51 }
 0x224   :  { %731 = vpow2.f32 %v282_v52 }
 0x225   :  { %733 = vpow2.f32 %v168_v60 }
 0x227   :  { %v183_v53 = vpop.permute.xlu2 %182 }
 0x228   :  { %v189_v54 = vsel %vm187_vm2, %v183_v53, 0 }
 0x229   :  { %198 = vmatpush.bf16.msra.mxu3 %v189_v54 }
 0x22a   :  { %v732_v55 = vpop.eup %731  ;;  %317 = vrot.lane.b32.xlu0 %v925_v12, %s871_s8 }
 0x22b   :  { %v287_v56 = vsel %vm114_vm1, %v732_v55, 0.0  ;;  %v734_v61 = vpop.eup %733 }
 0x22c   :  { %288 = vadd.xlane.f32.xlu2 %v287_v56  ;;  %v173_v62 = vsel %vm114_vm1, %v734_v61, 0.0 }
 0x22e   :  { %379 = vrot.lane.b32.xlu1 %v921_v8, %s873_s10 }
 0x22f   :  { %v205_v57 = vpop.permute.xlu2 %204 }
 0x230   :  { %v210_v58 = vsel %vm187_vm2, %v205_v57, 0 }
 0x231   :  { %219 = vmatpush.bf16.msrb.mxu3 %v210_v58 }
 0x232   :  { %402 = vrot.lane.b32.xlu0 %v925_v12, %s873_s10 }
 0x244   :  { %449 = vrot.lane.b32.xlu2 %v921_v8, %s874_s11 }
 0x24c   :  { %516 = vrot.lane.b32.xlu2 %v921_v8, %s875_s12 }
 0x254   :  { %539 = vrot.lane.b32.xlu2 %v925_v12, %s875_s12 }
 0x258   :  { %174 = vadd.xlane.f32.xlu1 %v173_v62 }
 0x271   :  { %404 = vrot.lane.b32.xlu1 %v925_v12, %s872_s9 }
 0x288   :  { %v286_v1 = vpop.xlane.xlu1 %285 }
 0x289   :  { %v172_v2 = vpop.xlane.xlu0 %171  ;;  %735 = vrcp.f32 %v286_v1 }
 0x28a   :  { %737 = vrcp.f32 %v172_v2 }
 0x28f   :  { %v736_v3 = vpop.eup %735 }
 0x290   :  { %v738_v4 = vpop.eup %737  ;;  %v292_v5 = vmul.f32 %v736_v3, %v728_v43 }
 0x291   :  { %v178_v6 = vmul.f32 %v738_v4, %v730_v44 }
 0x292   :  { %v294_v7 = vpack.c.bf16 %v292_v5, %v292_v5 }
 0x293   :  { %v180_v9 = vpack.c.bf16 %v178_v6, %v178_v6 }
 0x294   :  { %692 = vmatmul.msk.bf16.vlgmr.msrb.gmra.mxu2 %vm114_vm1, %v294_v7 }
 0x295   :  { %688 = vmatmul.msk.bf16.vlgmr.msra.gmra.mxu3 %vm114_vm1, %v180_v9 }
 0x29c   :  { %v318_v10 = vpop.permute.xlu0 %317 }
 0x29d   :  { %v323_v11 = vsel %vm187_vm2, %v318_v10, 0 }
 0x29e   :  { %332 = vmatpush.bf16.msra.mxu3 %v323_v11 }
 0x29f   :  { %v289_v13 = vpop.xlane.xlu2 %288 }
 0x2a0   :  { %v380_v14 = vpop.permute.xlu1 %379 }
 0x2a4   :  { %696 = vmatmul.msk.bf16.vlgmr.msra.gmra.mxu2 %vm114_vm1, %v380_v14  ;;  %v403_v28 = vpop.permute.xlu0 %402 }
 0x2a7   :  { %v450_v15 = vpop.permute.xlu2 %449 }
 0x2a8   :  { %v455_v16 = vsel %vm187_vm2, %v450_v15, 0 }
 0x2a9   :  { %464 = vmatpush.bf16.msrb.mxu0 %v455_v16 }
 0x2af   :  { %v517_v24 = vpop.permute.xlu2 %516 }
 0x2b0   :  { %v522_v27 = vsel %vm114_vm1, %v517_v24, 0 }
 0x2b7   :  { %v540_v41 = vpop.permute.xlu2 %539 }
 0x2b8   :  { %v545_v44 = vsel %vm114_vm1, %v540_v41, 0 }
 0x2cb   :  { %v175_v17 = vpop.xlane.xlu1 %174 }
 0x2cc   :  { %739 = vrcp.f32 %v175_v17 }
 0x2cd   :  { %741 = vrcp.f32 %v289_v13 }
 0x2d2   :  { %v740_v18 = vpop.eup %739 }
 0x2d3   :  { %v179_v19 = vmul.f32 %v740_v18, %v734_v61  ;;  %v742_v21 = vpop.eup %741 }
 0x2d4   :  { %v293_v22 = vmul.f32 %v742_v21, %v732_v55 }
 0x2d5   :  { %v181_v20 = vpack.c.bf16 %v179_v19, %v179_v19 }
 0x2d6   :  { %v295_v26 = vpack.c.bf16 %v293_v22, %v293_v22 }
 0x2d7   :  { %689 = vmatmul.msk.bf16.vlgmr.msrb.gmra.mxu3 %vm114_vm1, %v181_v20 }
 0x2e3   :  { %v405_v23 = vpop.permute.xlu1 %404 }
 0x2e4   :  { %v410_v25 = vsel %vm114_vm1, %v405_v23, 0 }
 0x2e5   :  { %419 = vmatpush.bf16.xpose.msrb.mxu3 %v410_v25 }
 0x2e7   :  { %693 = vmatmul.msk.bf16.vlgmr.msra.gmra.mxu3 %vm114_vm1, %v295_v26 }
 0x2ed   :  { %531 = vmatpush.bf16.xpose.msra.mxu3 %v522_v27 }
 0x2f7   :  { %697 = vmatmul.msk.bf16.vlgmr.msrb.gmra.mxu3 %vm114_vm1, %v403_v28 }
 0x317   :  { %v313_v29 = vpop.f32.mrf.mxu2 }
 0x318   :  { %v200_v30 = vpop.f32.mrf.mxu3 }
 0x31f   :  { %v315_v31 = vpop.f32.mrf.mxu2 }
 0x320   :  { %v202_v32 = vpop.f32.mrf.mxu3 }
 0x327   :  { %v398_v33 = vpop.f32.mrf.mxu2 }
 0x328   :  { %v425_v34 = vsel %vm114_vm1, %v398_v33, -inf }
 0x329   :  { %426 = vmax.xlane.f32.xlu0 %v425_v34 }
 0x32f   :  { %v400_v35 = vpop.f32.mrf.mxu2 }
 0x33d   :  { %514 = vrot.lane.b32.xlu0 %v921_v8, %s876_s13 }
 0x35a   :  { %v221_v38 = vpop.f32.mrf.mxu3 }
 0x35b   :  { %v225_v39 = vpack.c.bf16 %v221_v38, %v200_v30 }
 0x35d   :  { %695 = vmatmul.msk.bf16.vlgmr.msra.gmra.mxu1 %vm114_vm1, %v225_v39 }
 0x362   :  { %v223_v40 = vpop.f32.mrf.mxu3 }
 0x36a   :  { %v334_v42 = vpop.f32.mrf.mxu3 }
 0x36b   :  { %v338_v43 = vpack.c.bf16 %v334_v42, %v313_v29 }
 0x36d   :  { %694 = vmatmul.msk.bf16.vlgmr.msra.gmra.mxu0 %vm114_vm1, %v338_v43 }
 0x36e   :  { %554 = vmatpush.bf16.xpose.msra.mxu0 %v545_v44 }
 0x372   :  { %v336_v45 = vpop.f32.mrf.mxu3 }
 0x37a   :  { %v421_v46 = vpop.f32.mrf.mxu3 }
 0x37b   :  { %v428_v47 = vsel %vm114_vm1, %v421_v46, -inf }
 0x37c   :  { %429 = vmax.xlane.f32.xlu2 %v428_v47 }
 0x382   :  { %v423_v48 = vpop.f32.mrf.mxu3 }
 0x39c   :  { %v427_v49 = vpop.xlane.xlu0 %426 }
 0x39d   :  { %v431_v50 = vsub.f32 %v398_v33, %v427_v49 }
 0x39f   :  { %v433_v51 = vmul.f32 1.442695, %v431_v50 }
 0x3a1   :  { %743 = vpow2.f32 %v433_v51 }
 0x3a7   :  { %v744_v52 = vpop.eup %743 }
 0x3a8   :  { %v437_v53 = vsel %vm114_vm1, %v744_v52, 0.0 }
 0x3a9   :  { %438 = vadd.xlane.f32.xlu1 %v437_v53 }
 0x3af   :  { %v515_v54 = vpop.permute.xlu0 %514 }
 0x3b0   :  { %701 = vmatmul.msk.bf16.vlgmr.msra.gmra.mxu3 %vm114_vm1, %v515_v54 }
 0x3c2   :  { %537 = vrot.lane.b32.xlu1 %v925_v12, %s876_s13 }
 0x3ca   :  { %470 = vrot.lane.b32.xlu1 %v925_v12, %s874_s11 }
 0x3da   :  { %v374_v55 = vpop.f32.mrf.mxu1 }
 0x3e2   :  { %v376_v29 = vpop.f32.mrf.mxu1 }
 0x3ea   :  { %v354_v56 = vpop.f32.mrf.mxu0 }
 0x3eb   :  { %v992_v57 = vadd.f32 %v374_v55, %v354_v56 }
 0x3ef   :  { %v430_v58 = vpop.xlane.xlu2 %429 }
 0x3f0   :  { %v432_v59 = vsub.f32 %v421_v46, %v430_v58 }
 0x3f2   :  { %v435_v60 = vmul.f32 1.442695, %v432_v59  ;;  %v356_v18 = vpop.f32.mrf.mxu0 }
 0x3f4   :  { %745 = vpow2.f32 %v435_v60 }
 0x3fa   :  { %v746_v61 = vpop.eup %745 }
 0x3fb   :  { %v440_v62 = vsel %vm114_vm1, %v746_v61, 0.0 }
 0x3fc   :  { %441 = vadd.xlane.f32.xlu0 %v440_v62 }
 0x410   :  { %605 = vrot.lane.b32.xlu0 %v925_v12, %s877_s14  ;;  %v107_v12 = vld [vmem:[#allocation7 + $0x8] sm:$0xf] }
 0x411   :  { %v496_v10 = vsel %vm187_vm2, %v107_v12, 0 }
 0x412   :  { %505 = vmatpush.bf16.msrb.mxu2 %v496_v10 }
 0x41c   :  { %v439_v63 = vpop.xlane.xlu1 %438 }
 0x41d   :  { %747 = vrcp.f32 %v439_v63 }
 0x423   :  { %v748_v0 = vpop.eup %747 }
 0x424   :  { %v445_v1 = vmul.f32 %v748_v0, %v744_v52 }
 0x426   :  { %v447_v2 = vpack.c.bf16 %v445_v1, %v445_v1 }
 0x428   :  { %698 = vmatmul.msk.bf16.vlgmr.msrb.gmra.mxu0 %vm114_vm1, %v447_v2 }
 0x433   :  { %v533_v3 = vpop.f32.mrf.mxu3 }
 0x434   :  { %v538_v4 = vpop.permute.xlu1 %537  ;;  %v560_v5 = vsel %vm114_vm1, %v533_v3, -inf }
 0x435   :  { %561 = vmax.xlane.f32.xlu2 %v560_v5 }
 0x438   :  { %702 = vmatmul.msk.bf16.vlgmr.msra.gmra.mxu0 %vm114_vm1, %v538_v4 }
 0x43b   :  { %v535_v6 = vpop.f32.mrf.mxu3 }
 0x43c   :  { %v471_v7 = vpop.permute.xlu1 %470 }
 0x43d   :  { %v476_v9 = vsel %vm187_vm2, %v471_v7, 0 }
 0x43e   :  { %485 = vmatpush.bf16.msrb.mxu1 %v476_v9 }
 0x46f   :  { %v442_v11 = vpop.xlane.xlu0 %441 }
 0x470   :  { %749 = vrcp.f32 %v442_v11 }
 0x476   :  { %v750_v13 = vpop.eup %749 }
 0x477   :  { %v446_v14 = vmul.f32 %v750_v13, %v746_v61  ;;  %v377_v61 = vadd.f32 %v376_v29, %v356_v18 }
 0x479   :  { %v448_v15 = vpack.c.bf16 %v446_v14, %v446_v14 }
 0x47b   :  { %699 = vmatmul.msk.bf16.vlgmr.msrb.gmra.mxu1 %vm114_vm1, %v448_v15 }
 0x482   :  { %v606_v16 = vpop.permute.xlu0 %605 }
 0x483   :  { %v611_v17 = vsel %vm187_vm2, %v606_v16, 0 }
 0x484   :  { %620 = vmatpush.bf16.msra.mxu2 %v611_v17 }
 0x4a5   :  { %v466_v19 = vpop.f32.mrf.mxu0 }
 0x4a8   :  { %v562_v20 = vpop.xlane.xlu2 %561 }
 0x4a9   :  { %v566_v21 = vsub.f32 %v533_v3, %v562_v20 }
 0x4ab   :  { %v568_v22 = vmul.f32 1.442695, %v566_v21 }
 0x4ad   :  { %751 = vpow2.f32 %v568_v22  ;;  %v468_v23 = vpop.f32.mrf.mxu0 }
 0x4b3   :  { %v752_v24 = vpop.eup %751 }
 0x4b4   :  { %v572_v25 = vsel %vm114_vm1, %v752_v24, 0.0 }
 0x4b5   :  { %573 = vadd.xlane.f32.xlu2 %v572_v25  ;;  %v556_v26 = vpop.f32.mrf.mxu0 }
 0x4b6   :  { %v563_v27 = vsel %vm114_vm1, %v556_v26, -inf }
 0x4b7   :  { %564 = vmax.xlane.f32.xlu1 %v563_v27 }
 0x4bd   :  { %v558_v28 = vpop.f32.mrf.mxu0 }
 0x4f8   :  { %v487_v30 = vpop.f32.mrf.mxu1 }
 0x4f9   :  { %v491_v31 = vpack.c.bf16 %v487_v30, %v466_v19 }
 0x4fb   :  { %700 = vmatmul.msk.bf16.vlgmr.msrb.gmra.mxu2 %vm114_vm1, %v491_v31 }
 0x500   :  { %v489_v32 = vpop.f32.mrf.mxu1 }
 0x528   :  { %v574_v40 = vpop.xlane.xlu2 %573 }
 0x52a   :  { %v565_v33 = vpop.xlane.xlu1 %564 }
 0x52b   :  { %v567_v34 = vsub.f32 %v556_v26, %v565_v33 }
 0x52d   :  { %v570_v35 = vmul.f32 1.442695, %v567_v34 }
 0x52f   :  { %753 = vpow2.f32 %v570_v35 }
 0x530   :  { %755 = vrcp.f32 %v574_v40 }
 0x535   :  { %v754_v36 = vpop.eup %753 }
 0x536   :  { %v575_v37 = vsel %vm114_vm1, %v754_v36, 0.0  ;;  %v756_v42 = vpop.eup %755 }
 0x537   :  { %576 = vadd.xlane.f32.xlu2 %v575_v37  ;;  %v580_v44 = vmul.f32 %v756_v42, %v752_v24 }
 0x539   :  { %v582_v49 = vpack.c.bf16 %v580_v44, %v580_v44 }
 0x54f   :  { %584 = vrot.lane.b32.xlu2 %v921_v8, %s877_s14  ;;  %v108_v8 = vld [vmem:[#allocation7 + $0xc] sm:$0xf] }
 0x550   :  { %v631_v50 = vsel %vm187_vm2, %v108_v8, 0 }
 0x551   :  { %640 = vmatpush.bf16.msrb.mxu3 %v631_v50 }
 0x57e   :  { %v507_v38 = vpop.f32.mrf.mxu2 }
 0x57f   :  { %v512_v39 = vadd.f32 %v507_v38, %v992_v57  ;;  %v726_v57 = vld [vmem:[%s1030_s3] ss:$0 sm:$0xff] }
 0x586   :  { %v509_v51 = vpop.f32.mrf.mxu2 }
 0x587   :  { %v513_v62 = vadd.f32 %v509_v51, %v377_v61 }
 0x5aa   :  { %v577_v41 = vpop.xlane.xlu2 %576 }
 0x5ab   :  { %757 = vrcp.f32 %v577_v41 }
 0x5b1   :  { %v758_v43 = vpop.eup %757 }
 0x5b2   :  { %v581_v45 = vmul.f32 %v758_v43, %v754_v36  ;;  %v585_v46 = vpop.permute.xlu2 %584 }
 0x5b3   :  { %v590_v47 = vsel %vm187_vm2, %v585_v46, 0 }
 0x5b4   :  { %v583_v48 = vpack.c.bf16 %v581_v45, %v581_v45  ;;  %599 = vmatpush.bf16.msra.mxu1 %v590_v47 }
 0x5b6   :  { %704 = vmatmul.msk.bf16.vlgmr.msra.gmra.mxu2 %vm114_vm1, %v583_v48 }
 0x5b7   :  { %703 = vmatmul.msk.bf16.vlgmr.msra.gmra.mxu1 %vm114_vm1, %v582_v49 }
 0x634   :  { %v601_v52 = vpop.f32.mrf.mxu1 }
 0x639   :  { %v622_v53 = vpop.f32.mrf.mxu2 }
 0x63a   :  { %v626_v54 = vpack.c.bf16 %v622_v53, %v601_v52 }
 0x63c   :  { %v603_v55 = vpop.f32.mrf.mxu1  ;;  %705 = vmatmul.msk.bf16.vlgmr.msrb.gmra.mxu3 %vm114_vm1, %v626_v54 }
 0x641   :  { %v624_v56 = vpop.f32.mrf.mxu2 }
 0x6bf   :  { %v642_v58 = vpop.f32.mrf.mxu3 }
 0x6c0   :  { %v647_v59 = vadd.f32 %v642_v58, %v512_v39 }
 0x6c2   :  { %v653_v60 = vadd.f32 %v726_v57, %v647_v59 }
 0x6c4   :  { %655 = vst.msk [vmem:[#allocation8] sm:$0xff] %vm85_vm0, %v653_v60 }
 0x6c7   :  { %v644_v63 = vpop.f32.mrf.mxu3 }
 0x6c8   :  { %v648_v0 = vadd.f32 %v644_v63, %v513_v62 }
 0x6ca   :  { %v654_v1 = vadd.f32 %v726_v57, %v648_v0 }
 0x6cc   :  { %656 = vst.msk [vmem:[#allocation8 + $0x8] sm:$0xff] %vm85_vm0, %v654_v1 }
 0x6cd   :  { %669 = dma.vmem_to_hbm [thread:$0]  %s662_s18, 256, %s664_s21, [#allocation4], %s865_s27, %s865_s27, %s866_s1  }
 0x6ce   :  { %859 = dma.done.wait [#allocation4], 256  }
 0x6cf   :  { %860 = vsyncadd [#allocation4], 4294967040 }
 0x6d0   :  { %674 = vsyncpa [#allocation3], 1 }
 0x6d1   :  { %675 = vsyncpa [#allocation6], 1 }
 0x6d2   :  { %676 = vsyncpa [#allocation4], 1 }

</bundles_post_ra>
